<compile_context>
chip_gen: v7x
topology: tpu7x:2x2x1
jax: 0.10.0
libtpu: 0.0.40
codegen_flags: <defaults>
</compile_context>

<pallas_src>
import functools
import math

import jax
import jax.numpy as jnp
from jax.experimental import pallas as pl
from jax.experimental.pallas import tpu as pltpu


_INV_SQRT2 = 0.7071067811865476


def _erf_f32(x):
    # Abramowitz & Stegun 7.1.26 rational approximation (max abs err ~1.5e-7).
    # Uses only mul/add/exp/divide, all of which lower cleanly in Mosaic, and is
    # numerically indistinguishable (at f32) from the exact erf PyTorch uses.
    p = 0.3275911
    a1, a2, a3, a4, a5 = (0.254829592, -0.284496736, 1.421413741,
                          -1.453152027, 1.061405429)
    ax = jnp.abs(x)
    t = 1.0 / (1.0 + p * ax)
    poly = ((((a5 * t + a4) * t + a3) * t + a2) * t + a1) * t
    y = 1.0 - poly * jnp.exp(-ax * ax)
    return jnp.where(x < 0, -y, y)


def _gelu_exact(x):
    return 0.5 * x * (1.0 + _erf_f32(x * _INV_SQRT2))


def _projection_head_kernel(x_ref, wp_ref, bp_ref, wf_ref, bf_ref, o_ref, *, eps):
    # x_ref : (TM, in_dim)       row tile of the flattened input
    # wp_ref: (in_dim, out_dim)  projection weight, pre-transposed in the wrapper
    # bp_ref: (1, out_dim)
    # wf_ref: (out_dim, out_dim) fc weight, pre-transposed
    # bf_ref: (1, out_dim)
    # o_ref : (TM, out_dim)      lane-dense output tile, final layout
    x = x_ref[...]

    # projection: x @ Wp (already transposed) + bp
    h = jnp.dot(x, wp_ref[...], preferred_element_type=jnp.float32) + bp_ref[...]

    # exact-erf GELU
    a = _gelu_exact(h)

    # fc: gelu(h) @ Wf + bf
    y = jnp.dot(a.astype(wf_ref.dtype), wf_ref[...],
                preferred_element_type=jnp.float32) + bf_ref[...]

    # TODO(synk): nn.Dropout is identity in eval mode; train-mode stochastic
    # masking (pltpu.prng_*) is intentionally not implemented here.
    y = y + h  # residual

    # LayerNorm over the feature axis, elementwise_affine=False
    mu = jnp.mean(y, axis=-1, keepdims=True)
    c = y - mu
    var = jnp.mean(c * c, axis=-1, keepdims=True)
    o_ref[...] = (c * jax.lax.rsqrt(var + eps)).astype(o_ref.dtype)


def projection_head(x, params, *, eps=1e-5, tile_rows=128):
    """Pallas implementation of ProjectionHead.forward (eval mode)."""
    orig_shape = x.shape
    in_dim = orig_shape[-1]
    out_dim = params["w_proj"].shape[0]

    # Flatten all leading dims into a row axis; the kernel writes the final
    # (rows, out_dim) layout directly (lane-dense), so only a cheap reshape
    # of the leading dims remains outside the kernel.
    x2 = x.reshape(-1, in_dim).astype(jnp.float32)
    n_rows = x2.shape[0]

    # One-time wrapper-side transposes so the kernel never transposes.
    wp_t = params["w_proj"].T.astype(jnp.float32)          # (in_dim, out_dim)
    wf_t = params["w_fc"].T.astype(jnp.float32)            # (out_dim, out_dim)
    bp = params["b_proj"].reshape(1, out_dim).astype(jnp.float32)
    bf = params["b_fc"].reshape(1, out_dim).astype(jnp.float32)

    # Row tile: multiple of 8 (sublane), capped at tile_rows; pad rows if needed.
    tm = min(tile_rows, pl.cdiv(n_rows, 8) * 8)
    n_pad = pl.cdiv(n_rows, tm) * tm
    if n_pad != n_rows:
        x2 = jnp.pad(x2, ((0, n_pad - n_rows), (0, 0)))

    grid = (n_pad // tm,)
    kernel = functools.partial(_projection_head_kernel, eps=eps)

    out = pl.pallas_call(
        kernel,
        out_shape=jax.ShapeDtypeStruct((n_pad, out_dim), jnp.float32),
        grid_spec=pltpu.PrefetchScalarGridSpec(
            num_scalar_prefetch=0,
            grid=grid,
            in_specs=[
                pl.BlockSpec((tm, in_dim), lambda i: (i, 0)),        # x row tile
                pl.BlockSpec((in_dim, out_dim), lambda i: (0, 0)),   # Wp^T (resident)
                pl.BlockSpec((1, out_dim), lambda i: (0, 0)),        # bp
                pl.BlockSpec((out_dim, out_dim), lambda i: (0, 0)),  # Wf^T (resident)
                pl.BlockSpec((1, out_dim), lambda i: (0, 0)),        # bf
            ],
            out_specs=pl.BlockSpec((tm, out_dim), lambda i: (i, 0)), # lane-dense
        ),
        compiler_params=pltpu.CompilerParams(
            dimension_semantics=("parallel",)),
    )(x2, wp_t, bp, wf_t, bf)

    out = out[:n_rows]
    return out.reshape(*orig_shape[:-1], out_dim)


def _reference(x, params, eps=1e-5):
    """Pure-JAX reference mirroring the PyTorch module (eval mode)."""
    h = x @ params["w_proj"].T + params["b_proj"]
    a = jax.nn.gelu(h, approximate=False)          # exact erf GELU (nn.GELU default)
    y = a @ params["w_fc"].T + params["b_fc"]
    y = y + h                                      # dropout is identity in eval
    mu = jnp.mean(y, axis=-1, keepdims=True)
    var = jnp.mean((y - mu) ** 2, axis=-1, keepdims=True)
    return (y - mu) / jnp.sqrt(var + eps)


if __name__ == "__main__":
    # Small shapes consistent with ProjectionHead(in_dim, out_dim).
    B, S = 2, 8
    in_dim, out_dim = 32, 128

    key = jax.random.PRNGKey(0)
    k = jax.random.split(key, 6)

    x = jax.random.normal(k[0], (B, S, in_dim), dtype=jnp.float32)

    scale = 0.1
    params = {
        "w_proj": scale * jax.random.normal(k[1], (out_dim, in_dim), dtype=jnp.float32),
        "b_proj": scale * jax.random.normal(k[2], (out_dim,), dtype=jnp.float32),
        "w_fc":   scale * jax.random.normal(k[3], (out_dim, out_dim), dtype=jnp.float32),
        "b_fc":   scale * jax.random.normal(k[4], (out_dim,), dtype=jnp.float32),
    }

    out = projection_head(x, params)
    out = jax.block_until_ready(out)

    ref = _reference(x, params)
    assert out.shape == (B, S, out_dim), out.shape
    max_err = float(jnp.max(jnp.abs(out - ref)))
    assert jnp.allclose(out, ref, atol=1e-3, rtol=1e-3), f"max err {max_err}"

    print("KERNEL_OK")
</pallas_src>

<mosaic_0001>
module attributes {stable_mosaic.version = 11 : i64} {
  func.func @_projection_head_kernel(%arg0: i32, %arg1: memref<16x32xf32, #tpu.memory_space<vmem>>, %arg2: memref<32x128xf32, #tpu.memory_space<vmem>>, %arg3: memref<1x128xf32, #tpu.memory_space<vmem>>, %arg4: memref<128x128xf32, #tpu.memory_space<vmem>>, %arg5: memref<1x128xf32, #tpu.memory_space<vmem>>, %arg6: memref<16x128xf32, #tpu.memory_space<vmem>>) attributes {dimension_semantics = [#tpu.dimension_semantics<parallel>], iteration_bounds = array<i64: 1>, scalar_prefetch = 0 : i64, scratch_operands = 0 : i64, tpu.core_type = #tpu.core_type<tc>, window_params = [{transform_indices = @transform_0, window_bounds = array<i64: 16, 32>}, {pipeline_mode = #tpu.pipeline_mode<synchronous>, transform_indices = @transform_1, window_bounds = array<i64: 32, 128>}, {pipeline_mode = #tpu.pipeline_mode<synchronous>, transform_indices = @transform_2, window_bounds = array<i64: 1, 128>}, {pipeline_mode = #tpu.pipeline_mode<synchronous>, transform_indices = @transform_3, window_bounds = array<i64: 128, 128>}, {pipeline_mode = #tpu.pipeline_mode<synchronous>, transform_indices = @transform_4, window_bounds = array<i64: 1, 128>}, {transform_indices = @transform_5, window_bounds = array<i64: 16, 128>}]} {
    %c0 = arith.constant 0 : index
    %c0_0 = arith.constant 0 : index
    %0 = vector.load %arg1[%c0, %c0_0] : memref<16x32xf32, #tpu.memory_space<vmem>>, vector<16x32xf32>
    %c0_1 = arith.constant 0 : index
    %c0_2 = arith.constant 0 : index
    %1 = vector.load %arg2[%c0_1, %c0_2] : memref<32x128xf32, #tpu.memory_space<vmem>>, vector<32x128xf32>
    %cst = arith.constant dense<0.000000e+00> : vector<16x128xf32>
    %2 = tpu.matmul %0, %1, %cst {dimension_numbers = #tpu.dot_dimension_numbers<[1], [0], [0], [1], [0, 0, 1, 1], [], []>} : vector<16x32xf32>, vector<32x128xf32>, vector<16x128xf32> -> vector<16x128xf32>
    %c0_3 = arith.constant 0 : index
    %c0_4 = arith.constant 0 : index
    %3 = vector.load %arg3[%c0_3, %c0_4] : memref<1x128xf32, #tpu.memory_space<vmem>>, vector<1x128xf32>
    %4 = vector.broadcast %3 : vector<1x128xf32> to vector<16x128xf32>
    %5 = arith.addf %2, %4 : vector<16x128xf32>
    %cst_5 = arith.constant 5.000000e-01 : f32
    %6 = vector.broadcast %cst_5 : f32 to vector<16x128xf32>
    %7 = arith.mulf %6, %5 : vector<16x128xf32>
    %cst_6 = arith.constant 0.707106769 : f32
    %8 = vector.broadcast %cst_6 : f32 to vector<16x128xf32>
    %9 = arith.mulf %5, %8 : vector<16x128xf32>
    %10 = math.absf %9 : vector<16x128xf32>
    %cst_7 = arith.constant 0.327591091 : f32
    %11 = vector.broadcast %cst_7 : f32 to vector<16x128xf32>
    %12 = arith.mulf %11, %10 : vector<16x128xf32>
    %cst_8 = arith.constant 1.000000e+00 : f32
    %13 = vector.broadcast %cst_8 : f32 to vector<16x128xf32>
    %14 = arith.addf %13, %12 : vector<16x128xf32>
    %cst_9 = arith.constant 1.000000e+00 : f32
    %15 = vector.broadcast %cst_9 : f32 to vector<16x128xf32>
    %16 = arith.divf %15, %14 : vector<16x128xf32>
    %cst_10 = arith.constant 1.06140542 : f32
    %17 = vector.broadcast %cst_10 : f32 to vector<16x128xf32>
    %18 = arith.mulf %17, %16 : vector<16x128xf32>
    %cst_11 = arith.constant -1.45315206 : f32
    %19 = vector.broadcast %cst_11 : f32 to vector<16x128xf32>
    %20 = arith.addf %18, %19 : vector<16x128xf32>
    %21 = arith.mulf %20, %16 : vector<16x128xf32>
    %cst_12 = arith.constant 1.42141378 : f32
    %22 = vector.broadcast %cst_12 : f32 to vector<16x128xf32>
    %23 = arith.addf %21, %22 : vector<16x128xf32>
    %24 = arith.mulf %23, %16 : vector<16x128xf32>
    %cst_13 = arith.constant -0.284496725 : f32
    %25 = vector.broadcast %cst_13 : f32 to vector<16x128xf32>
    %26 = arith.addf %24, %25 : vector<16x128xf32>
    %27 = arith.mulf %26, %16 : vector<16x128xf32>
    %cst_14 = arith.constant 0.254829586 : f32
    %28 = vector.broadcast %cst_14 : f32 to vector<16x128xf32>
    %29 = arith.addf %27, %28 : vector<16x128xf32>
    %30 = arith.mulf %29, %16 : vector<16x128xf32>
    %cst_15 = arith.constant 0.000000e+00 : f32
    %31 = vector.broadcast %cst_15 : f32 to vector<16x128xf32>
    %32 = arith.subf %31, %10 : vector<16x128xf32>
    %33 = arith.mulf %32, %10 : vector<16x128xf32>
    %34 = math.exp %33 : vector<16x128xf32>
    %35 = arith.mulf %30, %34 : vector<16x128xf32>
    %cst_16 = arith.constant 1.000000e+00 : f32
    %36 = vector.broadcast %cst_16 : f32 to vector<16x128xf32>
    %37 = arith.subf %36, %35 : vector<16x128xf32>
    %cst_17 = arith.constant 0.000000e+00 : f32
    %38 = vector.broadcast %cst_17 : f32 to vector<16x128xf32>
    %39 = arith.cmpf olt, %9, %38 : vector<16x128xf32>
    %cst_18 = arith.constant 0.000000e+00 : f32
    %40 = vector.broadcast %cst_18 : f32 to vector<16x128xf32>
    %41 = arith.subf %40, %37 : vector<16x128xf32>
    %42 = arith.select %39, %41, %37 : vector<16x128xi1>, vector<16x128xf32>
    %cst_19 = arith.constant 1.000000e+00 : f32
    %43 = vector.broadcast %cst_19 : f32 to vector<16x128xf32>
    %44 = arith.addf %43, %42 : vector<16x128xf32>
    %45 = arith.mulf %7, %44 : vector<16x128xf32>
    %c0_20 = arith.constant 0 : index
    %c0_21 = arith.constant 0 : index
    %46 = vector.load %arg4[%c0_20, %c0_21] : memref<128x128xf32, #tpu.memory_space<vmem>>, vector<128x128xf32>
    %cst_22 = arith.constant dense<0.000000e+00> : vector<16x128xf32>
    %47 = tpu.matmul %45, %46, %cst_22 {dimension_numbers = #tpu.dot_dimension_numbers<[1], [0], [0], [1], [0, 0, 1, 1], [], []>} : vector<16x128xf32>, vector<128x128xf32>, vector<16x128xf32> -> vector<16x128xf32>
    %c0_23 = arith.constant 0 : index
    %c0_24 = arith.constant 0 : index
    %48 = vector.load %arg5[%c0_23, %c0_24] : memref<1x128xf32, #tpu.memory_space<vmem>>, vector<1x128xf32>
    %49 = vector.broadcast %48 : vector<1x128xf32> to vector<16x128xf32>
    %50 = arith.addf %47, %49 : vector<16x128xf32>
    %51 = arith.addf %50, %5 : vector<16x128xf32>
    %cst_25 = arith.constant dense<0.000000e+00> : vector<16xf32>
    %52 = vector.multi_reduction <add>, %51, %cst_25 [1] : vector<16x128xf32> to vector<16xf32>
    %53 = vector.shape_cast %52 : vector<16xf32> to vector<16x1xf32>
    %cst_26 = arith.constant 1.280000e+02 : f32
    %54 = vector.broadcast %cst_26 : f32 to vector<16x1xf32>
    %55 = arith.divf %53, %54 : vector<16x1xf32>
    %56 = vector.broadcast %55 : vector<16x1xf32> to vector<16x128xf32>
    %57 = arith.subf %51, %56 : vector<16x128xf32>
    %58 = arith.mulf %57, %57 : vector<16x128xf32>
    %cst_27 = arith.constant dense<0.000000e+00> : vector<16xf32>
    %59 = vector.multi_reduction <add>, %58, %cst_27 [1] : vector<16x128xf32> to vector<16xf32>
    %60 = vector.shape_cast %59 : vector<16xf32> to vector<16x1xf32>
    %cst_28 = arith.constant 1.280000e+02 : f32
    %61 = vector.broadcast %cst_28 : f32 to vector<16x1xf32>
    %62 = arith.divf %60, %61 : vector<16x1xf32>
    %cst_29 = arith.constant 9.99999974E-6 : f32
    %63 = vector.broadcast %cst_29 : f32 to vector<16x1xf32>
    %64 = arith.addf %62, %63 : vector<16x1xf32>
    %65 = math.rsqrt %64 : vector<16x1xf32>
    %66 = vector.broadcast %65 : vector<16x1xf32> to vector<16x128xf32>
    %67 = arith.mulf %57, %66 : vector<16x128xf32>
    %c0_30 = arith.constant 0 : index
    %c0_31 = arith.constant 0 : index
    %68 = vector.load %arg6[%c0_30, %c0_31] : memref<16x128xf32, #tpu.memory_space<vmem>>, vector<16x128xf32>
    tpu.vector_store %arg6[%c0_30, %c0_31], %67 {strides = array<i32>} : memref<16x128xf32, #tpu.memory_space<vmem>>, vector<16x128xf32>,
    return
  }
  func.func @transform_0(%arg0: i32) -> (i32, i32) {
    %c0_i32 = arith.constant 0 : i32
    %c0_i32_0 = arith.constant 0 : i32
    return %arg0, %c0_i32 : i32, i32
  }
  func.func @transform_1(%arg0: i32) -> (i32, i32) {
    %c0_i32 = arith.constant 0 : i32
    %c0_i32_0 = arith.constant 0 : i32
    %c0_i32_1 = arith.constant 0 : i32
    return %c0_i32, %c0_i32_0 : i32, i32
  }
  func.func @transform_2(%arg0: i32) -> (i32, i32) {
    %c0_i32 = arith.constant 0 : i32
    %c0_i32_0 = arith.constant 0 : i32
    %c0_i32_1 = arith.constant 0 : i32
    return %c0_i32, %c0_i32_0 : i32, i32
  }
  func.func @transform_3(%arg0: i32) -> (i32, i32) {
    %c0_i32 = arith.constant 0 : i32
    %c0_i32_0 = arith.constant 0 : i32
    %c0_i32_1 = arith.constant 0 : i32
    return %c0_i32, %c0_i32_0 : i32, i32
  }
  func.func @transform_4(%arg0: i32) -> (i32, i32) {
    %c0_i32 = arith.constant 0 : i32
    %c0_i32_0 = arith.constant 0 : i32
    %c0_i32_1 = arith.constant 0 : i32
    return %c0_i32, %c0_i32_0 : i32, i32
  }
  func.func @transform_5(%arg0: i32) -> (i32, i32) {
    %c0_i32 = arith.constant 0 : i32
    %c0_i32_0 = arith.constant 0 : i32
    return %arg0, %c0_i32 : i32, i32
  }
}

</mosaic_0001>

<bundles_post_ra>
// kernel: tpu_custom_call.1
= control target key start
LH: loop header
LB: loop body
LE: loop exit
PB: predicated region body
PF: predicated region fallthrough
CT: control target
= control target key end

     0   :  { %10 = vsyncpa [#allocation3], 0  ;;  %s699_s0 = inlined_call_operand.hbm [shape: f32[16,32], index: 0, kind: input, shape index: {}]   ;;  %s700_s1 = inlined_call_operand.hbm [shape: f32[32,128], index: 1, kind: input, shape index: {}]   ;;  %s701_s2 = inlined_call_operand.vmem [shape: f32[1,128], index: 2, kind: input, shape index: {}]   ;;  %s702_s3 = inlined_call_operand.hbm [shape: f32[128,128], index: 3, kind: input, shape index: {}]   ;;  %s703_s4 = inlined_call_operand.vmem [shape: f32[1,128], index: 4, kind: input, shape index: {}]   ;;  %s704_s5 = inlined_call_operand.hbm [shape: f32[16,128], index: 5, kind: output, shape index: {}]  }
   0x1   :  { %11 = vsyncpa [#allocation6], 0 }
   0x2   :  { %12 = vsyncpa [#allocation4], 0  ;;  %s580_s18 = smov [#allocation5]   ;;  %s581_s20 = smov [#allocation2]  }
   0x3   :  { %s30_s19 = sshll.u32 %s580_s18, 4  ;;  %s18_s21 = sshll.u32 %s581_s20, 4  ;;  %s31_s19 = int_to_ptr.vmem [resolvable:$true] %s30_s19  ;;  %s616_s21 = int_to_ptr.vmem [resolvable:$true] %s18_s21 }
   0x4   :  { %s486_s24 = scalar_lea.hbm %s700_s1, 512 }
   0x5   :  { %p487_p0 = scmp.ne.s32.totalorder %s700_s1, %s486_s24  ;;  %p490_p1 = scmp.lt.u32.totalorder %s486_s24, %s700_s1 }
   0x7   :  { %p492_p2 = pnand %p490_p1, %p487_p0 }
   0x9   :  { %495 = shalt.err (!%p492_p2)
}
   0xa   :  { %s496_s29 = scalar_lea.vmem %s31_s19, 512  ;;  %p501_p4 = scmp.lt.s32.totalorder %s31_s19, %s31_s19 }
   0xb   :  { %p497_p3 = scmp.ne.s32.totalorder %s31_s19, %s496_s29  ;;  %p502_p5 = scmp.lt.s32.totalorder %s496_s29, %s496_s29 }
   0xd   :  { %p503_p6 = por %p502_p5, %p501_p4 }
   0xf   :  { %p504_p7 = pnand %p503_p6, %p497_p3 }
  0x11   :  { %507 = shalt.err (!%p504_p7)
}
  0x12   :  { %s582_s30 = smov 128   ;;  %s583_s6 = smov 8  }
  0x13   :  { %36 = dma.hbm_to_vmem [thread:$0]  %s700_s1, 512, %s31_s19, [#allocation6], %s582_s30, %s582_s30, %s583_s6  }
  0x14   :  { %s508_s11 = scalar_lea.hbm %s699_s0, 256 }
  0x15   :  { %p509_p8 = scmp.ne.s32.totalorder %s699_s0, %s508_s11  ;;  %p512_p9 = scmp.lt.u32.totalorder %s508_s11, %s699_s0 }
  0x17   :  { %p514_p10 = pnand %p512_p9, %p509_p8 }
  0x19   :  { %517 = shalt.err (!%p514_p10)
}
  0x1a   :  { %s518_s16 = scalar_lea.vmem %s616_s21, 256  ;;  %p523_p12 = scmp.lt.s32.totalorder %s616_s21, %s616_s21 }
  0x1b   :  { %p519_p11 = scmp.ne.s32.totalorder %s616_s21, %s518_s16  ;;  %p524_p13 = scmp.lt.s32.totalorder %s518_s16, %s518_s16 }
  0x1d   :  { %p525_p0 = por %p524_p13, %p523_p12 }
  0x1f   :  { %p526_p1 = pnand %p525_p0, %p519_p11 }
  0x21   :  { %529 = shalt.err (!%p526_p1)
}
  0x22   :  { %24 = dma.hbm_to_vmem [thread:$0]  %s699_s0, 256, %s616_s21, [#allocation3], %s582_s30, %s582_s30, %s583_s6  }
  0x23   :  { %s584_s18 = smov [#allocation7]   ;;  %s530_s23 = scalar_lea.hbm %s702_s3, 2048 }
  0x24   :  { %s44_s19 = sshll.u32 %s584_s18, 4  ;;  %p531_p2 = scmp.ne.s32.totalorder %s702_s3, %s530_s23  ;;  %s45_s19 = int_to_ptr.vmem [resolvable:$true] %s44_s19 }
  0x25   :  { %p534_p3 = scmp.lt.u32.totalorder %s530_s23, %s702_s3 }
  0x27   :  { %p536_p4 = pnand %p534_p3, %p531_p2 }
  0x29   :  { %539 = shalt.err (!%p536_p4)
}
  0x2a   :  { %s540_s28 = scalar_lea.vmem %s45_s19, 2048  ;;  %p545_p6 = scmp.lt.s32.totalorder %s45_s19, %s45_s19 }
  0x2b   :  { %p541_p5 = scmp.ne.s32.totalorder %s45_s19, %s540_s28  ;;  %p546_p7 = scmp.lt.s32.totalorder %s540_s28, %s540_s28 }
  0x2d   :  { %p547_p8 = por %p546_p7, %p545_p6 }
  0x2f   :  { %p548_p9 = pnand %p547_p8, %p541_p5 }
  0x31   :  { %551 = shalt.err (!%p548_p9)
}
  0x32   :  { %50 = dma.hbm_to_vmem [thread:$0]  %s702_s3, 2048, %s45_s19, [#allocation6], %s582_s30, %s582_s30, %s583_s6  }
  0x33   :  { %574 = dma.done.wait [#allocation3], 256  }
  0x34   :  { %575 = vsyncadd [#allocation3], 4294967040 }
  0x35   :  { %576 = dma.done.wait [#allocation6], 2560  }
  0x36   :  { %577 = vsyncadd [#allocation6], 4294964736  ;;  %vm75_vm0 = vcmask 261120   ;;  %v64_v0 = vld [vmem:[#allocation5] sm:$0xff]  ;;  %v65_v1 = vld [vmem:[#allocation5 + $0x8] sm:$0xff] }
  0x37   :  { %v66_v2 = vld [vmem:[#allocation5 + $0x10] sm:$0xff]  ;;  %v428_v3 = vpack.c.bf16 %v65_v1, %v64_v0  ;;  %v67_v4 = vld [vmem:[#allocation5 + $0x18] sm:$0xff]  ;;  %v211_v8 = vld [vmem:[#allocation7] sm:$0xff] }
  0x38   :  { %v62_v5 = vld [vmem:[#allocation2] sm:$0xff]  ;;  %v432_v6 = vpack.c.bf16 %v67_v4, %v66_v2  ;;  %v63_v7 = vld [vmem:[#allocation2 + $0x8] sm:$0xff]  ;;  %v212_v9 = vld [vmem:[#allocation7 + $0x8] sm:$0xff] }
  0x39   :  { %390 = vmatprep.mubr.msk.f32.mxu0 %vm75_vm0, %v62_v5  ;;  %429 = vmatprep.subr.bf16.mxu0 %v428_v3  ;;  %v213_v10 = vld [vmem:[#allocation7 + $0x10] sm:$0xff]  ;;  %v436_v11 = vpack.c.bf16 %v212_v9, %v211_v8  ;;  %v214_v12 = vld [vmem:[#allocation7 + $0x18] sm:$0xff]  ;;  %v215_v14 = vld [vmem:[#allocation7 + $0x20] sm:$0xff] }
  0x3a   :  { %431 = vmatpush3.bf16.msra.mxu0 %v428_v3  ;;  %v440_v13 = vpack.c.bf16 %v214_v12, %v213_v10  ;;  %v216_v15 = vld [vmem:[#allocation7 + $0x28] sm:$0xff]  ;;  %v217_v17 = vld [vmem:[#allocation7 + $0x30] sm:$0xff]  ;;  %v218_v18 = vld [vmem:[#allocation7 + $0x38] sm:$0xff] }
  0x3b   :  { %433 = vmatprep.subr.bf16.mxu0 %v432_v6  ;;  %437 = vmatprep.subr.bf16.mxu1 %v436_v11  ;;  %v444_v16 = vpack.c.bf16 %v216_v15, %v215_v14  ;;  %v448_v19 = vpack.c.bf16 %v218_v18, %v217_v17  ;;  %v219_v20 = vld [vmem:[#allocation7 + $0x40] sm:$0xff]  ;;  %v220_v21 = vld [vmem:[#allocation7 + $0x48] sm:$0xff]  ;;  %v221_v23 = vld [vmem:[#allocation7 + $0x50] sm:$0xff] }
  0x3c   :  { %439 = vmatpush3.bf16.msra.mxu1 %v436_v11  ;;  %v452_v22 = vpack.c.bf16 %v220_v21, %v219_v20  ;;  %v222_v24 = vld [vmem:[#allocation7 + $0x58] sm:$0xff]  ;;  %v223_v26 = vld [vmem:[#allocation7 + $0x60] sm:$0xff]  ;;  %v224_v27 = vld [vmem:[#allocation7 + $0x68] sm:$0xff] }
  0x3d   :  { %441 = vmatprep.subr.bf16.mxu1 %v440_v13  ;;  %v456_v25 = vpack.c.bf16 %v222_v24, %v221_v23  ;;  %v460_v28 = vpack.c.bf16 %v224_v27, %v223_v26  ;;  %v225_v29 = vld [vmem:[#allocation7 + $0x70] sm:$0xff]  ;;  %v226_v30 = vld [vmem:[#allocation7 + $0x78] sm:$0xff] }
  0x3e   :  { %435 = vmatpush3.bf16.msra.mxu0 %v432_v6  ;;  %v464_v31 = vpack.c.bf16 %v226_v30, %v225_v29  ;;  %v354_v32 = vld [vmem:[%s701_s2] ss:$0 sm:$0xff] }
  0x3f   :  { %v357_v23 = vld [vmem:[%s703_s4] ss:$0 sm:$0xff]  ;;  %s585_s4 = smov [#allocation8]  }
  0x40   :  { %443 = vmatpush3.bf16.msra.mxu1 %v440_v13  ;;  %s341_s8 = sshll.u32 %s585_s4, 4  ;;  %s342_s8 = int_to_ptr.vmem [resolvable:$true] %s341_s8 }
  0x41   :  { %391 = vmatmul.mubr.msk.f32.vlgmr.msra.gmra.mrb[0].mxu0 %vm75_vm0, %v63_v7  ;;  %445 = vmatprep.subr.bf16.mxu1 %v444_v16  ;;  %s552_s9 = scalar_lea.vmem %s342_s8, 256  ;;  %p557_p11 = scmp.lt.s32.totalorder %s342_s8, %s342_s8 }
  0x42   :  { %p553_p10 = scmp.ne.s32.totalorder %s342_s8, %s552_s9  ;;  %p558_p12 = scmp.lt.s32.totalorder %s552_s9, %s552_s9 }
  0x44   :  { %447 = vmatpush3.bf16.msra.mxu1 %v444_v16  ;;  %p559_p13 = por %p558_p12, %p557_p11 }
  0x45   :  { %449 = vmatprep.subr.bf16.mxu1 %v448_v19 }
  0x46   :  { %p560_p0 = pnand %p559_p13, %p553_p10 }
  0x48   :  { %451 = vmatpush3.bf16.msra.mxu1 %v448_v19 }
  0x49   :  { %453 = vmatprep.subr.bf16.mxu1 %v452_v22 }
  0x4c   :  { %455 = vmatpush3.bf16.msra.mxu1 %v452_v22 }
  0x4d   :  { %457 = vmatprep.subr.bf16.mxu1 %v456_v25 }
  0x50   :  { %459 = vmatpush3.bf16.msra.mxu1 %v456_v25 }
  0x51   :  { %461 = vmatprep.subr.bf16.mxu1 %v460_v28 }
  0x54   :  { %463 = vmatpush3.bf16.msra.mxu1 %v460_v28 }
  0x55   :  { %465 = vmatprep.subr.bf16.mxu1 %v464_v31 }
  0x58   :  { %467 = vmatpush3.bf16.msra.mxu1 %v464_v31 }
 0x114   :  { %v392_v33 = vpop.f32.mrb[0].mxu0 }
 0x115   :  { %v671_v34 = vadd.f32 %v392_v33, %v354_v32  ;;  %v148_v35 = vpop.f32.mrb[1].mxu0 }
 0x116   :  { %v673_v36 = vadd.f32 %v354_v32, %v148_v35 }
 0x117   :  { %v160_v37 = vmul.f32 0.70710677, %v671_v34  ;;  %v158_v20 = vmul.f32 0.5, %v671_v34 }
 0x118   :  { %v159_v38 = vmul.f32 0.70710677, %v673_v36  ;;  %v157_v18 = vmul.f32 0.5, %v673_v36 }
 0x119   :  { %v162_v39 = vand.u32 2147483647, %v160_v37  ;;  %vm202_vm1 = vcmp.lt.f32.partialorder %v160_v37, 0.0 }
 0x11a   :  { %v161_v40 = vand.u32 2147483647, %v159_v38  ;;  %vm201_vm2 = vcmp.lt.f32.partialorder %v159_v38, 0.0 }
 0x11b   :  { %v164_v41 = vmul.f32 0.3275911, %v162_v39  ;;  %v190_v45 = vsub.f32 0.0, %v162_v39 }
 0x11c   :  { %v163_v42 = vmul.f32 0.3275911, %v161_v40  ;;  %v189_v46 = vsub.f32 0.0, %v161_v40 }
 0x11d   :  { %v166_v43 = vadd.f32 1.0, %v164_v41  ;;  %v192_v48 = vmul.f32 %v190_v45, %v162_v39 }
 0x11e   :  { %v165_v44 = vadd.f32 1.0, %v163_v42  ;;  %v191_v50 = vmul.f32 %v189_v46, %v161_v40 }
 0x11f   :  { %474 = vrcp.f32 %v166_v43  ;;  %v195_v54 = vmul.f32 1.442695, %v192_v48 }
 0x120   :  { %476 = vrcp.f32 %v165_v44  ;;  %v193_v56 = vmul.f32 1.442695, %v191_v50 }
 0x121   :  { %478 = vpow2.f32 %v195_v54 }
 0x122   :  { %480 = vpow2.f32 %v193_v56 }
 0x129   :  { %v475_v47 = vpop.eup %474 }
 0x12a   :  { %v477_v49 = vpop.eup %476  ;;  %v172_v51 = vmul.f32 1.0614054, %v475_v47 }
 0x12b   :  { %v171_v52 = vmul.f32 1.0614054, %v477_v49  ;;  %v479_v6 = vpop.eup %478 }
 0x12c   :  { %v174_v53 = vadd.f32 -1.4531521, %v172_v51  ;;  %v481_v8 = vpop.eup %480 }
 0x12d   :  { %v173_v55 = vadd.f32 -1.4531521, %v171_v52 }
 0x12e   :  { %v176_v57 = vmul.f32 %v475_v47, %v174_v53 }
 0x12f   :  { %v175_v58 = vmul.f32 %v477_v49, %v173_v55 }
 0x130   :  { %v178_v59 = vadd.f32 1.4214138, %v176_v57 }
 0x131   :  { %v177_v60 = vadd.f32 1.4214138, %v175_v58 }
 0x132   :  { %v180_v61 = vmul.f32 %v475_v47, %v178_v59 }
 0x133   :  { %v179_v62 = vmul.f32 %v477_v49, %v177_v60 }
 0x134   :  { %v182_v63 = vadd.f32 -0.28449672, %v180_v61 }
 0x135   :  { %v181_v0 = vadd.f32 -0.28449672, %v179_v62 }
 0x136   :  { %v184_v1 = vmul.f32 %v475_v47, %v182_v63 }
 0x137   :  { %v183_v2 = vmul.f32 %v477_v49, %v181_v0 }
 0x138   :  { %v186_v3 = vadd.f32 0.2548296, %v184_v1 }
 0x139   :  { %v185_v4 = vadd.f32 0.2548296, %v183_v2 }
 0x13a   :  { %v188_v5 = vmul.f32 %v475_v47, %v186_v3 }
 0x13b   :  { %v187_v7 = vmul.f32 %v477_v49, %v185_v4 }
 0x13c   :  { %v198_v9 = vmul.f32 %v479_v6, %v188_v5 }
 0x13d   :  { %v197_v10 = vmul.f32 %v481_v8, %v187_v7 }
 0x13e   :  { %v200_v11 = vsub.f32 1.0, %v198_v9 }
 0x13f   :  { %v199_v12 = vsub.f32 1.0, %v197_v10 }
 0x140   :  { %v204_v13 = vsub.f32 0.0, %v200_v11 }
 0x141   :  { %v203_v14 = vsub.f32 0.0, %v199_v12 }
 0x142   :  { %v206_v15 = vsel %vm202_vm1, %v204_v13, %v200_v11 }
 0x143   :  { %v205_v16 = vsel %vm201_vm2, %v203_v14, %v199_v12  ;;  %v208_v17 = vadd.f32 1.0, %v206_v15 }
 0x144   :  { %v207_v19 = vadd.f32 1.0, %v205_v16 }
 0x145   :  { %v210_v22 = vmul.f32 %v208_v17, %v158_v20 }
 0x146   :  { %v209_v21 = vmul.f32 %v207_v19, %v157_v18 }
 0x148   :  { %425 = vmatprep.mubr.f32.mxu1 %v209_v21 }
 0x149   :  { %426 = vmatmul.mubr.f32.vlgmr.msra.gmra.mrb[0].mxu1 %v210_v22 }
 0x21c   :  { %v427_v24 = vpop.f32.mrb[0].mxu1 }
 0x21d   :  { %v300_v25 = vpop.f32.mrb[1].mxu1  ;;  %v306_v27 = vadd.f32 %v427_v24, %v357_v23 }
 0x21e   :  { %v301_v26 = vadd.f32 %v357_v23, %v300_v25 }
 0x21f   :  { %v310_v29 = vadd.f32 %v306_v27, %v671_v34 }
 0x220   :  { %v309_v28 = vadd.f32 %v301_v26, %v673_v36 }
 0x222   :  { %311 = vadd.xlane.f32.xlu0 %v309_v28 }
 0x226   :  { %313 = vadd.xlane.f32.xlu0 %v310_v29 }
 0x2af   :  { %v312_v30 = vpop.xlane.xlu0 %311 }
 0x2b0   :  { %v316_v31 = vmul.f32 0.0078125, %v312_v30 }
 0x2b2   :  { %v318_v32 = vsub.f32 %v309_v28, %v316_v31 }
 0x2b3   :  { %v314_v33 = vpop.xlane.xlu0 %313 }
 0x2b4   :  { %v317_v35 = vmul.f32 0.0078125, %v314_v33  ;;  %v320_v37 = vmul.f32 %v318_v32, %v318_v32 }
 0x2b6   :  { %v319_v38 = vsub.f32 %v310_v29, %v317_v35  ;;  %322 = vadd.xlane.f32.xlu1 %v320_v37 }
 0x2b8   :  { %v321_v39 = vmul.f32 %v319_v38, %v319_v38 }
 0x2ba   :  { %324 = vadd.xlane.f32.xlu1 %v321_v39 }
 0x343   :  { %v323_v40 = vpop.xlane.xlu1 %322 }
 0x344   :  { %v326_v41 = vmul.f32 0.0078125, %v323_v40 }
 0x346   :  { %v328_v42 = vadd.f32 1e-05, %v326_v41 }
 0x347   :  { %v325_v43 = vpop.xlane.xlu1 %324 }
 0x348   :  { %482 = vrsqrt.f32 %v328_v42  ;;  %v327_v36 = vmul.f32 0.0078125, %v325_v43 }
 0x34a   :  { %v329_v44 = vadd.f32 1e-05, %v327_v36 }
 0x34c   :  { %484 = vrsqrt.f32 %v329_v44 }
 0x352   :  { %v483_v34 = vpop.eup %482 }
 0x353   :  { %v332_v45 = vmul.f32 %v483_v34, %v318_v32 }
 0x355   :  { %334 = vst [vmem:[#allocation8] sm:$0xff] %v332_v45 }
 0x356   :  { %v485_v46 = vpop.eup %484 }
 0x357   :  { %v333_v47 = vmul.f32 %v485_v46, %v319_v38 }
 0x359   :  { %335 = vst [vmem:[#allocation8 + $0x8] sm:$0xff] %v333_v47 }
 0x35a   :  { %563 = shalt.err (!%p560_p0)
}
 0x35b   :  { %s564_s12 = scalar_lea.hbm %s704_s5, 256 }
 0x35c   :  { %p565_p1 = scmp.ne.s32.totalorder %s704_s5, %s564_s12  ;;  %p568_p2 = scmp.lt.u32.totalorder %s564_s12, %s704_s5 }
 0x35e   :  { %p570_p3 = pnand %p568_p2, %p565_p1 }
 0x360   :  { %573 = shalt.err (!%p570_p3)
}
 0x361   :  { %347 = dma.vmem_to_hbm [thread:$0]  %s342_s8, 256, %s704_s5, [#allocation4], %s582_s30, %s582_s30, %s583_s6  }
 0x362   :  { %578 = dma.done.wait [#allocation4], 256  }
 0x363   :  { %579 = vsyncadd [#allocation4], 4294967040 }
 0x364   :  { %351 = vsyncpa [#allocation3], 1 }
 0x365   :  { %352 = vsyncpa [#allocation6], 1 }
 0x366   :  { %353 = vsyncpa [#allocation4], 1 }

</bundles_post_ra>
